<compile_context>
chip_gen: v5e
topology: v5e:2x2
jax: 0.10.0
libtpu: 0.0.40
codegen_flags: <defaults>
</compile_context>

<pallas_src>
import functools

import jax
import jax.numpy as jnp
from jax.experimental import pallas as pl
from jax.experimental.pallas import tpu as pltpu


def _round_up(x, m):
    return (x + m - 1) // m * m


def _cdiv(a, b):
    return -(-a // b)


def _mlp_kernel(x_ref, w1_ref, b1_ref, w2_ref, b2_ref, w3_ref, b3_ref, o_ref):
    # x_ref: (TM, 784) bf16; weights bf16; biases f32; o_ref: (TM, 10) f32.
    x = x_ref[...]
    h1 = jnp.dot(x, w1_ref[...], preferred_element_type=jnp.float32) + b1_ref[...]
    h1 = jnp.maximum(h1, 0.0).astype(jnp.bfloat16)
    h2 = jnp.dot(h1, w2_ref[...], preferred_element_type=jnp.float32) + b2_ref[...]
    h2 = jnp.maximum(h2, 0.0).astype(jnp.bfloat16)
    o_ref[...] = (
        jnp.dot(h2, w3_ref[...], preferred_element_type=jnp.float32) + b3_ref[...]
    )


def prepare_params(params):
    """One-time (outside the per-call jitted path) dtype/layout prep of the weights."""
    w1, b1, w2, b2, w3, b3 = params
    return (
        w1.astype(jnp.bfloat16), b1.reshape(1, -1).astype(jnp.float32),
        w2.astype(jnp.bfloat16), b2.reshape(1, -1).astype(jnp.float32),
        w3.astype(jnp.bfloat16), b3.reshape(1, -1).astype(jnp.float32),
    )


@jax.jit
def mlp_forward(x_nchw, prepared_params):
    """Forward pass equivalent to the PyTorch MLP module (x.view(B,-1); fc1;relu;fc2;relu;fc3)."""
    w1, b1, w2, b2, w3, b3 = prepared_params
    B = x_nchw.shape[0]
    K = w1.shape[0]      # 784
    H1 = w1.shape[1]     # 128
    H2 = w2.shape[1]     # 64
    N = w3.shape[1]      # num_classes (10)

    # ---- batch tiling ------------------------------------------------------
    # TM multiple of 16 (bf16 sublane packing), capped at 1024 rows.
    # For B > 16 force an even number (>= 2) of grid steps so both v7x TCs get
    # work, while keeping batch padding to at most ~one sublane group per step.
    TM_CAP = 1024
    if B <= 16:
        n_steps = 1
        TM = _round_up(max(B, 1), 16)
    else:
        n_steps = max(2, _cdiv(B, TM_CAP))
        n_steps = 2 * _cdiv(n_steps, 2)  # even -> balanced across 2 TCs on v7x
        TM = _round_up(_cdiv(B, n_steps), 16)
    B_pad = n_steps * TM

    # ---- input prep: flatten, cast to bf16 FIRST, then pad batch rows only --
    x_flat = x_nchw.reshape(B, -1).astype(jnp.bfloat16)  # == torch x.view(B, -1)
    if B_pad != B:
        x_flat = jnp.pad(x_flat, ((0, B_pad - B), (0, 0)))

    grid = (n_steps,)

    flops = 2 * B_pad * (K * H1 + H1 * H2 + H2 * N)
    bytes_accessed = (
        B_pad * K * 2                               # x (bf16)
        + (K * H1 + H1 * H2 + H2 * N) * 2           # weights (bf16, resident)
        + (H1 + H2 + N) * 4                         # biases (f32)
        + B_pad * N * 4                             # output (f32, narrow)
    )

    out_p = pl.pallas_call(
        _mlp_kernel,
        out_shape=jax.ShapeDtypeStruct((B_pad, N), jnp.float32),
        grid_spec=pltpu.PrefetchScalarGridSpec(
            num_scalar_prefetch=0,
            grid=grid,
            in_specs=[
                pl.BlockSpec((TM, K), lambda i: (i, 0)),    # x: batch-tiled
                pl.BlockSpec((K, H1), lambda i: (0, 0)),    # w1 (resident)
                pl.BlockSpec((1, H1), lambda i: (0, 0)),    # b1
                pl.BlockSpec((H1, H2), lambda i: (0, 0)),   # w2
                pl.BlockSpec((1, H2), lambda i: (0, 0)),    # b2
                pl.BlockSpec((H2, N), lambda i: (0, 0)),    # w3
                pl.BlockSpec((1, N), lambda i: (0, 0)),     # b3
            ],
            out_specs=pl.BlockSpec((TM, N), lambda i: (i, 0)),
        ),
        compiler_params=pltpu.CompilerParams(
            dimension_semantics=("parallel",),
            # ~4 MiB peak VMEM at TM=1024 -> default scoped VMEM is plenty on v5e/v6e/v7x.
        ),
        cost_estimate=pl.CostEstimate(
            flops=flops, transcendentals=0, bytes_accessed=bytes_accessed
        ),
    )(x_flat, w1, b1, w2, b2, w3, b3)

    # Strip batch padding (no lane padding to strip: output is already (B_pad, N)).
    return out_p[:B]


def init_mlp_params(key, input_channels=1, image_size=28, num_classes=10):
    """Deterministic init matching nn.Linear shapes (weights stored transposed as (in, out))."""
    in_f = input_channels * image_size * image_size
    dims = [(in_f, 128), (128, 64), (64, num_classes)]
    params = []
    for fan_in, fan_out in dims:
        key, kw, kb = jax.random.split(key, 3)
        bound = 1.0 / jnp.sqrt(fan_in)  # PyTorch Linear default uniform bound
        w = jax.random.uniform(kw, (fan_in, fan_out), jnp.float32, -bound, bound)
        b = jax.random.uniform(kb, (fan_out,), jnp.float32, -bound, bound)
        params += [w, b]
    return tuple(params)


def mlp_reference(x_nchw, params):
    """Plain JAX f32 reference for correctness check."""
    w1, b1, w2, b2, w3, b3 = params
    x = x_nchw.reshape(x_nchw.shape[0], -1).astype(jnp.float32)
    h1 = jnp.maximum(x @ w1 + b1, 0.0)
    h2 = jnp.maximum(h1 @ w2 + b2, 0.0)
    return h2 @ w3 + b3


if __name__ == "__main__":
    key = jax.random.PRNGKey(0)
    k_x, k_p = jax.random.split(key)

    B, C, H, W = 2, 1, 28, 28
    x = jax.random.normal(k_x, (B, C, H, W), jnp.float32)
    params = init_mlp_params(k_p, input_channels=C, image_size=H, num_classes=10)
    prepared = prepare_params(params)

    out = mlp_forward(x, prepared)
    out = jax.block_until_ready(out)

    ref = mlp_reference(x, params)
    assert out.shape == (B, 10), out.shape
    # bf16 matmuls (f32 accumulation) -> loosen tolerance vs the f32 reference.
    assert jnp.allclose(out, ref, atol=3e-2, rtol=3e-2), "mismatch vs reference"

    print("KERNEL_OK")
</pallas_src>

<mosaic_0001>
module attributes {stable_mosaic.version = 11 : i64} {
  func.func @_mlp_kernel(%arg0: i32, %arg1: memref<16x784xbf16, #tpu.memory_space<vmem>>, %arg2: memref<784x128xbf16, #tpu.memory_space<vmem>>, %arg3: memref<1x128xf32, #tpu.memory_space<vmem>>, %arg4: memref<128x64xbf16, #tpu.memory_space<vmem>>, %arg5: memref<1x64xf32, #tpu.memory_space<vmem>>, %arg6: memref<64x10xbf16, #tpu.memory_space<vmem>>, %arg7: memref<1x10xf32, #tpu.memory_space<vmem>>, %arg8: memref<16x10xf32, #tpu.memory_space<vmem>>) attributes {dimension_semantics = [#tpu.dimension_semantics<parallel>], iteration_bounds = array<i64: 1>, scalar_prefetch = 0 : i64, scratch_operands = 0 : i64, tpu.core_type = #tpu.core_type<tc>, window_params = [{transform_indices = @transform_0, window_bounds = array<i64: 16, 784>}, {pipeline_mode = #tpu.pipeline_mode<synchronous>, transform_indices = @transform_1, window_bounds = array<i64: 784, 128>}, {pipeline_mode = #tpu.pipeline_mode<synchronous>, transform_indices = @transform_2, window_bounds = array<i64: 1, 128>}, {pipeline_mode = #tpu.pipeline_mode<synchronous>, transform_indices = @transform_3, window_bounds = array<i64: 128, 64>}, {pipeline_mode = #tpu.pipeline_mode<synchronous>, transform_indices = @transform_4, window_bounds = array<i64: 1, 64>}, {pipeline_mode = #tpu.pipeline_mode<synchronous>, transform_indices = @transform_5, window_bounds = array<i64: 64, 10>}, {pipeline_mode = #tpu.pipeline_mode<synchronous>, transform_indices = @transform_6, window_bounds = array<i64: 1, 10>}, {transform_indices = @transform_7, window_bounds = array<i64: 16, 10>}]} {
    %c0 = arith.constant 0 : index
    %c0_0 = arith.constant 0 : index
    %0 = vector.load %arg1[%c0, %c0_0] : memref<16x784xbf16, #tpu.memory_space<vmem>>, vector<16x784xbf16>
    %c0_1 = arith.constant 0 : index
    %c0_2 = arith.constant 0 : index
    %1 = vector.load %arg2[%c0_1, %c0_2] : memref<784x128xbf16, #tpu.memory_space<vmem>>, vector<784x128xbf16>
    %cst = arith.constant dense<0.000000e+00> : vector<16x128xf32>
    %2 = tpu.matmul %0, %1, %cst {dimension_numbers = #tpu.dot_dimension_numbers<[1], [0], [0], [1], [0, 0, 1, 1], [], []>} : vector<16x784xbf16>, vector<784x128xbf16>, vector<16x128xf32> -> vector<16x128xf32>
    %c0_3 = arith.constant 0 : index
    %c0_4 = arith.constant 0 : index
    %3 = vector.load %arg3[%c0_3, %c0_4] : memref<1x128xf32, #tpu.memory_space<vmem>>, vector<1x128xf32>
    %4 = vector.broadcast %3 : vector<1x128xf32> to vector<16x128xf32>
    %5 = arith.addf %2, %4 : vector<16x128xf32>
    %cst_5 = arith.constant 0.000000e+00 : f32
    %6 = vector.broadcast %cst_5 : f32 to vector<16x128xf32>
    %7 = arith.maximumf %5, %6 : vector<16x128xf32>
    %8 = arith.truncf %7 : vector<16x128xf32> to vector<16x128xbf16>
    %c0_6 = arith.constant 0 : index
    %c0_7 = arith.constant 0 : index
    %9 = vector.load %arg4[%c0_6, %c0_7] : memref<128x64xbf16, #tpu.memory_space<vmem>>, vector<128x64xbf16>
    %cst_8 = arith.constant dense<0.000000e+00> : vector<16x64xf32>
    %10 = tpu.matmul %8, %9, %cst_8 {dimension_numbers = #tpu.dot_dimension_numbers<[1], [0], [0], [1], [0, 0, 1, 1], [], []>} : vector<16x128xbf16>, vector<128x64xbf16>, vector<16x64xf32> -> vector<16x64xf32>
    %c0_9 = arith.constant 0 : index
    %c0_10 = arith.constant 0 : index
    %11 = vector.load %arg5[%c0_9, %c0_10] : memref<1x64xf32, #tpu.memory_space<vmem>>, vector<1x64xf32>
    %12 = vector.broadcast %11 : vector<1x64xf32> to vector<16x64xf32>
    %13 = arith.addf %10, %12 : vector<16x64xf32>
    %cst_11 = arith.constant 0.000000e+00 : f32
    %14 = vector.broadcast %cst_11 : f32 to vector<16x64xf32>
    %15 = arith.maximumf %13, %14 : vector<16x64xf32>
    %16 = arith.truncf %15 : vector<16x64xf32> to vector<16x64xbf16>
    %c0_12 = arith.constant 0 : index
    %c0_13 = arith.constant 0 : index
    %17 = vector.load %arg6[%c0_12, %c0_13] : memref<64x10xbf16, #tpu.memory_space<vmem>>, vector<64x10xbf16>
    %cst_14 = arith.constant dense<0.000000e+00> : vector<16x10xf32>
    %18 = tpu.matmul %16, %17, %cst_14 {dimension_numbers = #tpu.dot_dimension_numbers<[1], [0], [0], [1], [0, 0, 1, 1], [], []>} : vector<16x64xbf16>, vector<64x10xbf16>, vector<16x10xf32> -> vector<16x10xf32>
    %c0_15 = arith.constant 0 : index
    %c0_16 = arith.constant 0 : index
    %19 = vector.load %arg7[%c0_15, %c0_16] : memref<1x10xf32, #tpu.memory_space<vmem>>, vector<1x10xf32>
    %20 = vector.broadcast %19 : vector<1x10xf32> to vector<16x10xf32>
    %21 = arith.addf %18, %20 : vector<16x10xf32>
    %c0_17 = arith.constant 0 : index
    %c0_18 = arith.constant 0 : index
    %22 = vector.load %arg8[%c0_17, %c0_18] : memref<16x10xf32, #tpu.memory_space<vmem>>, vector<16x10xf32>
    tpu.vector_store %arg8[%c0_17, %c0_18], %21 {strides = array<i32>} : memref<16x10xf32, #tpu.memory_space<vmem>>, vector<16x10xf32>,
    return
  }
  func.func @transform_0(%arg0: i32) -> (i32, i32) {
    %c0_i32 = arith.constant 0 : i32
    %c0_i32_0 = arith.constant 0 : i32
    return %arg0, %c0_i32 : i32, i32
  }
  func.func @transform_1(%arg0: i32) -> (i32, i32) {
    %c0_i32 = arith.constant 0 : i32
    %c0_i32_0 = arith.constant 0 : i32
    %c0_i32_1 = arith.constant 0 : i32
    return %c0_i32, %c0_i32_0 : i32, i32
  }
  func.func @transform_2(%arg0: i32) -> (i32, i32) {
    %c0_i32 = arith.constant 0 : i32
    %c0_i32_0 = arith.constant 0 : i32
    %c0_i32_1 = arith.constant 0 : i32
    return %c0_i32, %c0_i32_0 : i32, i32
  }
  func.func @transform_3(%arg0: i32) -> (i32, i32) {
    %c0_i32 = arith.constant 0 : i32
    %c0_i32_0 = arith.constant 0 : i32
    %c0_i32_1 = arith.constant 0 : i32
    return %c0_i32, %c0_i32_0 : i32, i32
  }
  func.func @transform_4(%arg0: i32) -> (i32, i32) {
    %c0_i32 = arith.constant 0 : i32
    %c0_i32_0 = arith.constant 0 : i32
    %c0_i32_1 = arith.constant 0 : i32
    return %c0_i32, %c0_i32_0 : i32, i32
  }
  func.func @transform_5(%arg0: i32) -> (i32, i32) {
    %c0_i32 = arith.constant 0 : i32
    %c0_i32_0 = arith.constant 0 : i32
    %c0_i32_1 = arith.constant 0 : i32
    return %c0_i32, %c0_i32_0 : i32, i32
  }
  func.func @transform_6(%arg0: i32) -> (i32, i32) {
    %c0_i32 = arith.constant 0 : i32
    %c0_i32_0 = arith.constant 0 : i32
    %c0_i32_1 = arith.constant 0 : i32
    return %c0_i32, %c0_i32_0 : i32, i32
  }
  func.func @transform_7(%arg0: i32) -> (i32, i32) {
    %c0_i32 = arith.constant 0 : i32
    %c0_i32_0 = arith.constant 0 : i32
    return %arg0, %c0_i32 : i32, i32
  }
}

</mosaic_0001>

<bundles_post_ra>
// kernel: mlp_forward.1
= control target key start
LH: loop header
LB: loop body
LE: loop exit
PB: predicated region body
PF: predicated region fallthrough
CT: control target
= control target key end

     0   :  { %12 = vsyncpa [#allocation3], 0  ;;  %s1108_s27 = smov [#allocation2]   ;;  %s1109_s29 = smov 64   ;;  %s1247_s0 = inlined_call_operand.vmem [shape: bf16[16,784], index: 0, kind: input, shape index: {}]   ;;  %s1248_s1 = inlined_call_operand.hbm [shape: bf16[784,128], index: 1, kind: input, shape index: {}]   ;;  %s1249_s2 = inlined_call_operand.vmem [shape: f32[1,128], index: 2, kind: input, shape index: {}]   ;;  %s1250_s3 = inlined_call_operand.vmem [shape: bf16[128,64], index: 3, kind: input, shape index: {}]   ;;  %s1251_s4 = inlined_call_operand.vmem [shape: f32[1,64], index: 4, kind: input, shape index: {}]   ;;  %s1252_s5 = inlined_call_operand.vmem [shape: bf16[64,10], index: 5, kind: input, shape index: {}]   ;;  %s1253_s6 = inlined_call_operand.vmem [shape: f32[1,10], index: 6, kind: input, shape index: {}]   ;;  %s1254_s7 = inlined_call_operand.vmem [shape: f32[16,10], index: 7, kind: output, shape index: {}]  }
   0x1   :  { %s19_s26 = sshll.u32 %s1248_s1, 4  ;;  %s21_s28 = sshll.u32 %s1108_s27, 4  ;;  %s20_s26 = int_to_ptr.hbm [resolvable:$true] %s19_s26  ;;  %s22_s28 = int_to_ptr.vmem [resolvable:$true] %s21_s28 }
   0x2   :  { %s1110_s30 = smov 4  }
   0x3   :  { %27 = dma.hbm_to_vmem [thread:$0]  %s20_s26, 6272, %s22_s28, [#allocation3], %s1109_s29, %s1109_s29, %s1110_s30  }
   0x4   :  { %1106 = dma.done.wait [#allocation3], 6272  }
   0x5   :  { %1107 = vsyncadd [#allocation3], 4294961024  ;;  %v1022_v0 = vld [vmem:[#allocation2 + $0x38] sm:$0xff]  ;;  %v1021_v4 = vld [vmem:[#allocation2 + $0x30] sm:$0xff]  ;;  %vm482_vm0 = vcmask 130048   ;;  %vm708_vm1 = vcmask 523264  }
   0x6   :  { %v1030_v1 = vld [vmem:[#allocation2 + $0x78] sm:$0xff]  ;;  %486 = vmatpush.bf16.msra.mxu0 %v1022_v0  ;;  %v1029_v5 = vld [vmem:[#allocation2 + $0x70] sm:$0xff]  ;;  %v1020_v8 = vld [vmem:[#allocation2 + $0x28] sm:$0xff]  ;;  %vm726_vm2 = vcmask 80896  }
   0x7   :  { %v1038_v2 = vld [vmem:[#allocation2 + $0xb8] sm:$0xff]  ;;  %500 = vmatpush.bf16.msra.mxu1 %v1030_v1  ;;  %v1037_v6 = vld [vmem:[#allocation2 + $0xb0] sm:$0xff]  ;;  %v1028_v9 = vld [vmem:[#allocation2 + $0x68] sm:$0xff] }
   0x8   :  { %v1046_v3 = vld [vmem:[#allocation2 + $0xf8] sm:$0xff]  ;;  %514 = vmatpush.bf16.msra.mxu2 %v1038_v2  ;;  %v1045_v7 = vld [vmem:[#allocation2 + $0xf0] sm:$0xff]  ;;  %v1036_v10 = vld [vmem:[#allocation2 + $0xa8] sm:$0xff] }
   0x9   :  { %528 = vmatpush.bf16.msra.mxu3 %v1046_v3  ;;  %v1044_v11 = vld [vmem:[#allocation2 + $0xe8] sm:$0xff]  ;;  %v1019_v12 = vld [vmem:[#allocation2 + $0x20] sm:$0xff]  ;;  %v1018_v16 = vld [vmem:[#allocation2 + $0x18] sm:$0xff] }
   0xa   :  { %487 = vmatpush.bf16.msra.mxu0 %v1021_v4  ;;  %v1027_v13 = vld [vmem:[#allocation2 + $0x60] sm:$0xff]  ;;  %v1026_v17 = vld [vmem:[#allocation2 + $0x58] sm:$0xff]  ;;  %v1017_v20 = vld [vmem:[#allocation2 + $0x10] sm:$0xff] }
   0xb   :  { %501 = vmatpush.bf16.msra.mxu1 %v1029_v5  ;;  %v1035_v14 = vld [vmem:[#allocation2 + $0xa0] sm:$0xff]  ;;  %v1034_v18 = vld [vmem:[#allocation2 + $0x98] sm:$0xff]  ;;  %v1025_v21 = vld [vmem:[#allocation2 + $0x50] sm:$0xff] }
   0xc   :  { %515 = vmatpush.bf16.msra.mxu2 %v1037_v6  ;;  %v1043_v15 = vld [vmem:[#allocation2 + $0xe0] sm:$0xff]  ;;  %v1042_v19 = vld [vmem:[#allocation2 + $0xd8] sm:$0xff]  ;;  %v1033_v22 = vld [vmem:[#allocation2 + $0x90] sm:$0xff] }
   0xd   :  { %529 = vmatpush.bf16.msra.mxu3 %v1045_v7  ;;  %v1041_v23 = vld [vmem:[#allocation2 + $0xd0] sm:$0xff]  ;;  %v1016_v24 = vld [vmem:[#allocation2 + $0x8] sm:$0xff]  ;;  %v1015_v28 = vld [vmem:[#allocation2] sm:$0xff] }
   0xe   :  { %488 = vmatpush.bf16.msra.mxu0 %v1020_v8  ;;  %v1024_v25 = vld [vmem:[#allocation2 + $0x48] sm:$0xff]  ;;  %v1023_v29 = vld [vmem:[#allocation2 + $0x40] sm:$0xff]  ;;  %v1011_v31 = vld [vmem:[%s1247_s0 + $0x18] sm:$0xf0] }
   0xf   :  { %502 = vmatpush.bf16.msra.mxu1 %v1028_v9  ;;  %v1032_v26 = vld [vmem:[#allocation2 + $0x88] sm:$0xff]  ;;  %v736_v30 = vld [vmem:[%s1247_s0] sm:$0xf]  ;;  %v1008_v32 = vld [vmem:[%s1247_s0 + $0x4] sm:$0xf] }
  0x10   :  { %516 = vmatpush.bf16.msra.mxu2 %v1036_v10  ;;  %v1040_v27 = vld [vmem:[#allocation2 + $0xc8] sm:$0xff]  ;;  %v738_v33 = vld [vmem:[%s1247_s0 + $0x1c] sm:$0xf0]  ;;  %v1054_v34 = vld [vmem:[#allocation2 + $0x138] sm:$0xff]  ;;  %v737_v40 = vor.u32 %v1011_v31, %v736_v30 }
  0x11   :  { %530 = vmatpush.bf16.msra.mxu3 %v1044_v11  ;;  %v1062_v35 = vld [vmem:[#allocation2 + $0x178] sm:$0xff]  ;;  %v1031_v36 = vld [vmem:[#allocation2 + $0x80] sm:$0xff]  ;;  %v744_v38 = vld [vmem:[%s1247_s0 + $0x8] sm:$0xf]  ;;  %v741_v43 = vor.u32 %v1008_v32, %v738_v33 }
  0x12   :  { %489 = vmatpush.bf16.msra.mxu0 %v1019_v12  ;;  %v1039_v37 = vld [vmem:[#allocation2 + $0xc0] sm:$0xff]  ;;  %v1009_v41 = vld [vmem:[%s1247_s0 + $0xc] sm:$0xf]  ;;  %v746_v42 = vld [vmem:[%s1247_s0 + $0x24] sm:$0xf0] }
  0x13   :  { %503 = vmatpush.bf16.msra.mxu1 %v1027_v13  ;;  %v1012_v39 = vld [vmem:[%s1247_s0 + $0x20] sm:$0xf0]  ;;  %v1053_v45 = vld [vmem:[#allocation2 + $0x130] sm:$0xff]  ;;  %v749_v48 = vor.u32 %v1009_v41, %v746_v42  ;;  %v1052_v49 = vld [vmem:[#allocation2 + $0x128] sm:$0xff] }
  0x14   :  { %517 = vmatpush.bf16.msra.mxu2 %v1035_v14  ;;  %v1063_v44 = vld [vmem:[#allocation2 + $0x180] sm:$0xff]  ;;  %v1061_v46 = vld [vmem:[#allocation2 + $0x170] sm:$0xff]  ;;  %v745_v47 = vor.u32 %v1012_v39, %v744_v38  ;;  %v1060_v50 = vld [vmem:[#allocation2 + $0x168] sm:$0xff] }
  0x15   :  { %531 = vmatpush.bf16.msra.mxu3 %v1043_v15  ;;  %v1051_v51 = vld [vmem:[#allocation2 + $0x120] sm:$0xff]  ;;  %v1050_v53 = vld [vmem:[#allocation2 + $0x118] sm:$0xff]  ;;  %v1014_v56 = vld [vmem:[%s1247_s0 + $0x30] sm:$0xf0] }
  0x16   :  { %490 = vmatpush.bf16.msra.mxu0 %v1018_v16  ;;  %v1059_v52 = vld [vmem:[#allocation2 + $0x160] sm:$0xff]  ;;  %v1058_v54 = vld [vmem:[#allocation2 + $0x158] sm:$0xff]  ;;  %v1049_v57 = vld [vmem:[#allocation2 + $0x110] sm:$0xff] }
  0x17   :  { %504 = vmatpush.bf16.msra.mxu1 %v1026_v17  ;;  %v760_v55 = vld [vmem:[%s1247_s0 + $0x18] sm:$0xf]  ;;  %v1057_v58 = vld [vmem:[#allocation2 + $0x150] sm:$0xff]  ;;  %v1048_v60 = vld [vmem:[#allocation2 + $0x108] sm:$0xff] }
  0x18   :  { %518 = vmatpush.bf16.msra.mxu2 %v1034_v18  ;;  %v761_v59 = vor.u32 %v1014_v56, %v760_v55  ;;  %v1056_v61 = vld [vmem:[#allocation2 + $0x148] sm:$0xff]  ;;  %v1047_v62 = vld [vmem:[#allocation2 + $0x100] sm:$0xff]  ;;  %v752_v0 = vld [vmem:[%s1247_s0 + $0x10] sm:$0xf] }
  0x19   :  { %532 = vmatpush.bf16.msra.mxu3 %v1042_v19  ;;  %v1055_v63 = vld [vmem:[#allocation2 + $0x140] sm:$0xff]  ;;  %v1013_v1 = vld [vmem:[%s1247_s0 + $0x28] sm:$0xf0]  ;;  %v1010_v2 = vld [vmem:[%s1247_s0 + $0x14] sm:$0xf] }
  0x1a   :  { %491 = vmatpush.bf16.msra.mxu0 %v1017_v20  ;;  %v754_v3 = vld [vmem:[%s1247_s0 + $0x2c] sm:$0xf0]  ;;  %v753_v4 = vor.u32 %v1013_v1, %v752_v0  ;;  %v1071_v6 = vld [vmem:[%s1250_s3 + $0x38] sm:$0xff]  ;;  %v1069_v8 = vld [vmem:[%s1250_s3 + $0x28] sm:$0xff] }
  0x1b   :  { %505 = vmatpush.bf16.msra.mxu1 %v1025_v21  ;;  %v757_v5 = vor.u32 %v1010_v2, %v754_v3  ;;  %v1070_v7 = vld [vmem:[%s1250_s3 + $0x30] sm:$0xff]  ;;  %v1068_v9 = vld [vmem:[%s1250_s3 + $0x20] sm:$0xff]  ;;  %v1067_v10 = vld [vmem:[%s1250_s3 + $0x18] sm:$0xff] }
  0x1c   :  { %519 = vmatpush.bf16.msra.mxu2 %v1033_v22  ;;  %v1066_v11 = vld [vmem:[%s1250_s3 + $0x10] sm:$0xff]  ;;  %v1065_v12 = vld [vmem:[%s1250_s3 + $0x8] sm:$0xff]  ;;  %v1064_v16 = vld [vmem:[%s1250_s3] sm:$0xff] }
  0x1d   :  { %533 = vmatpush.bf16.msra.mxu3 %v1041_v23  ;;  %v1079_v17 = vld [vmem:[%s1249_s2] ss:$0 sm:$0xff]  ;;  %v1075_v18 = vld [vmem:[%s1252_s5 + $0x18] sm:$0xff] }
  0x1e   :  { %492 = vmatpush.bf16.msra.mxu0 %v1016_v24 }
  0x1f   :  { %506 = vmatpush.bf16.msra.mxu1 %v1024_v25 }
  0x20   :  { %520 = vmatpush.bf16.msra.mxu2 %v1032_v26 }
  0x21   :  { %534 = vmatpush.bf16.msra.mxu3 %v1040_v27 }
  0x22   :  { %493 = vmatpush.bf16.msra.mxu0 %v1015_v28 }
  0x23   :  { %507 = vmatpush.bf16.msra.mxu1 %v1023_v29 }
  0x24   :  { %521 = vmatpush.bf16.msra.mxu2 %v1031_v36 }
  0x25   :  { %535 = vmatpush.bf16.msra.mxu3 %v1039_v37  ;;  %494 = vmatmul.bf16.vlgmr.msra.gmra.mxu0 %v737_v40 }
  0x26   :  { %542 = vmatpush.bf16.msrb.mxu0 %v1054_v34  ;;  %508 = vmatmul.bf16.vlgmr.msra.gmra.mxu1 %v741_v43 }
  0x27   :  { %556 = vmatpush.bf16.msrb.mxu1 %v1062_v35  ;;  %522 = vmatmul.bf16.vlgmr.msra.gmra.mxu2 %v745_v47  ;;  %v1074_v47 = vld [vmem:[%s1252_s5 + $0x10] sm:$0xff] }
  0x28   :  { %577 = vmatpush.bf16.msrb.mxu2 %v1063_v44  ;;  %536 = vmatmul.bf16.vlgmr.msra.gmra.mxu3 %v749_v48  ;;  %v1073_v48 = vld [vmem:[%s1252_s5 + $0x8] sm:$0xff] }
  0x29   :  { %655 = vmatpush.bf16.msrb.mxu3 %v1071_v6 }
  0x2a   :  { %543 = vmatpush.bf16.msrb.mxu0 %v1053_v45 }
  0x2b   :  { %557 = vmatpush.bf16.msrb.mxu1 %v1061_v46 }
  0x2c   :  { %716 = vmatpush.bf16.msra.mxu2 %v1075_v18 }
  0x2d   :  { %656 = vmatpush.bf16.msrb.mxu3 %v1070_v7 }
  0x2e   :  { %544 = vmatpush.bf16.msrb.mxu0 %v1052_v49  ;;  %v1072_v49 = vld [vmem:[%s1252_s5] sm:$0xff] }
  0x2f   :  { %558 = vmatpush.bf16.msrb.mxu1 %v1060_v50 }
  0x30   :  { %717 = vmatpush.bf16.msra.mxu2 %v1074_v47 }
  0x31   :  { %657 = vmatpush.bf16.msrb.mxu3 %v1069_v8 }
  0x32   :  { %545 = vmatpush.bf16.msrb.mxu0 %v1051_v51  ;;  %v1080_v51 = vld [vmem:[%s1251_s4] ss:$0 sm:$0xff] }
  0x33   :  { %559 = vmatpush.bf16.msrb.mxu1 %v1059_v52 }
  0x34   :  { %718 = vmatpush.bf16.msra.mxu2 %v1073_v48 }
  0x35   :  { %658 = vmatpush.bf16.msrb.mxu3 %v1068_v9 }
  0x36   :  { %546 = vmatpush.bf16.msrb.mxu0 %v1050_v53 }
  0x37   :  { %560 = vmatpush.bf16.msrb.mxu1 %v1058_v54  ;;  %958 = vmatmul.msk.bf16.vlgmr.msrb.gmra.mxu2 %vm482_vm0, %v761_v59 }
  0x38   :  { %719 = vmatpush.bf16.msra.mxu2 %v1072_v49 }
  0x39   :  { %659 = vmatpush.bf16.msrb.mxu3 %v1067_v10 }
  0x3a   :  { %547 = vmatpush.bf16.msrb.mxu0 %v1049_v57 }
  0x3b   :  { %561 = vmatpush.bf16.msrb.mxu1 %v1057_v58  ;;  %v1081_v58 = vld [vmem:[%s1253_s6] ss:$0 sm:$0xff] }
  0x3d   :  { %660 = vmatpush.bf16.msrb.mxu3 %v1066_v11 }
  0x3e   :  { %548 = vmatpush.bf16.msrb.mxu0 %v1048_v60 }
  0x3f   :  { %562 = vmatpush.bf16.msrb.mxu1 %v1056_v61 }
  0x41   :  { %661 = vmatpush.bf16.msrb.mxu3 %v1065_v12 }
  0x42   :  { %549 = vmatpush.bf16.msrb.mxu0 %v1047_v62 }
  0x43   :  { %563 = vmatpush.bf16.msrb.mxu1 %v1055_v63 }
  0x45   :  { %550 = vmatmul.bf16.vlgmr.msrb.gmra.mxu0 %v753_v4  ;;  %662 = vmatpush.bf16.msrb.mxu3 %v1064_v16 }
  0x46   :  { %564 = vmatmul.bf16.vlgmr.msrb.gmra.mxu1 %v757_v5 }
  0xa2   :  { %v495_v13 = vpop.f32.mrf.mxu0 }
  0xa3   :  { %v509_v14 = vpop.f32.mrf.mxu1  ;;  %v496_v19 = vadd.f32 %v1079_v17, %v495_v13 }
  0xa5   :  { %v510_v23 = vadd.f32 %v509_v14, %v496_v19 }
  0xaa   :  { %v523_v15 = vpop.f32.mrf.mxu2  ;;  %v497_v20 = vpop.f32.mrf.mxu0 }
  0xab   :  { %v511_v21 = vpop.f32.mrf.mxu1  ;;  %v537_v24 = vpop.f32.mrf.mxu3  ;;  %v498_v25 = vadd.f32 %v1079_v17, %v497_v20  ;;  %v524_v26 = vadd.f32 %v523_v15, %v510_v23 }
  0xad   :  { %v512_v27 = vadd.f32 %v511_v21, %v498_v25  ;;  %v538_v30 = vadd.f32 %v537_v24, %v524_v26 }
  0xb2   :  { %v525_v22 = vpop.f32.mrf.mxu2 }
  0xb3   :  { %v526_v32 = vadd.f32 %v525_v22, %v512_v27  ;;  %v539_v34 = vpop.f32.mrf.mxu3 }
  0xb5   :  { %v540_v35 = vadd.f32 %v539_v34, %v526_v32 }
  0xba   :  { %v579_v31 = vpop.f32.mrf.mxu2 }
  0xc2   :  { %v551_v28 = vpop.f32.mrf.mxu0  ;;  %v581_v42 = vpop.f32.mrf.mxu2 }
  0xc3   :  { %v565_v29 = vpop.f32.mrf.mxu1  ;;  %v552_v33 = vadd.f32 %v551_v28, %v538_v30 }
  0xc5   :  { %v566_v36 = vadd.f32 %v565_v29, %v552_v33 }
  0xc7   :  { %v580_v40 = vadd.f32 %v579_v31, %v566_v36 }
  0xc9   :  { %v584_v44 = vmax.f32 %v580_v40, 0.0 }
  0xca   :  { %v553_v37 = vpop.f32.mrf.mxu0 }
  0xcb   :  { %v554_v38 = vadd.f32 %v553_v37, %v540_v35  ;;  %v567_v39 = vpop.f32.mrf.mxu1 }
  0xcd   :  { %v568_v41 = vadd.f32 %v567_v39, %v554_v38 }
  0xcf   :  { %v582_v43 = vadd.f32 %v581_v42, %v568_v41 }
  0xd1   :  { %v585_v45 = vmax.f32 %v582_v43, 0.0 }
  0xd3   :  { %v586_v46 = vpack.c.bf16 %v585_v45, %v584_v44 }
  0xd5   :  { %663 = vmatmul.bf16.vlgmr.msrb.gmra.mxu3 %v586_v46 }
 0x158   :  { %v664_v50 = vpop.f32.mrf.mxu3 }
 0x159   :  { %v665_v52 = vadd.f32 %v1080_v51, %v664_v50 }
 0x15b   :  { %v669_v55 = vmax.f32 %v665_v52, 0.0 }
 0x160   :  { %v666_v53 = vpop.f32.mrf.mxu3 }
 0x161   :  { %v667_v54 = vadd.f32 %v1080_v51, %v666_v53 }
 0x163   :  { %v670_v56 = vmax.f32 %v667_v54, 0.0 }
 0x165   :  { %v671_v57 = vpack.c.bf16 %v670_v56, %v669_v55 }
 0x167   :  { %1007 = vmatmul.msk.bf16.vlgmr.msra.gmra.mxu2 %vm708_vm1, %v671_v57 }
 0x1ea   :  { %v721_v59 = vpop.f32.mrf.mxu2 }
 0x1eb   :  { %v722_v60 = vadd.f32 %v1081_v58, %v721_v59 }
 0x1ed   :  { %727 = vst.msk [vmem:[%s1254_s7] sm:$0xff] %vm726_vm2, %v722_v60 }
 0x1f2   :  { %v723_v61 = vpop.f32.mrf.mxu2 }
 0x1f3   :  { %v724_v62 = vadd.f32 %v1081_v58, %v723_v61 }
 0x1f5   :  { %728 = vst.msk [vmem:[%s1254_s7 + $0x8] sm:$0xff] %vm726_vm2, %v724_v62 }
 0x1f6   :  { %733 = vsyncpa [#allocation3], 1 }

</bundles_post_ra>
